<compile_context>
chip_gen: v7x
topology: tpu7x:2x2x1
jax: 0.10.0
libtpu: 0.0.40
codegen_flags: <defaults>
</compile_context>

<pallas_src>
import jax
import jax.numpy as jnp
from jax import lax
from jax.experimental import pallas as pl
from jax.experimental.pallas import tpu as pltpu


def _round_up(a: int, m: int) -> int:
    return (a + m - 1) // m * m


# Working-set budget for the double-buffered x/out blocks (conservative: fits inside
# every generation's raisable scoped-VMEM ceiling with headroom for weights/scratch).
_VMEM_TILE_BUDGET = 24 * 1024 * 1024
_VMEM_LIMIT_BYTES = 32 * 1024 * 1024


# ---------------------------------------------------------------------------
# FactorizationMachine kernel (feature-major x tiles)
# ---------------------------------------------------------------------------
def fm_kernel(x_ref, wv_ref, vsq_ref, b_ref, o_ref):
    # x_ref:   (n, TB)   feature-major activation tile (f32 or bf16)
    # wv_ref:  (1+k, n)  row 0 = linear W, rows 1.. = V
    # vsq_ref: (1, n)    sum_k V[k, :]^2  (folds the sum_of_square matmul)
    # b_ref:   (1, 1)    scalar bias in SMEM
    x = x_ref[...].astype(jnp.float32)                              # in-kernel upcast (bf16 ok)

    # Plain contractions over n; batch is already on the lane axis. For bit-level
    # parity with f32 PyTorch one could pin precision=HIGHEST / move these tiny
    # contractions to the VPU; tolerance here is 1e-4 so default precision is fine.
    y = lax.dot_general(wv_ref[...], x,
                        dimension_numbers=(((1,), (0,)), ((), ())),
                        preferred_element_type=jnp.float32)         # (1+k, TB)
    sos = lax.dot_general(vsq_ref[...], x * x,
                          dimension_numbers=(((1,), (0,)), ((), ())),
                          preferred_element_type=jnp.float32)       # (1, TB)

    lin = y[0:1, :]                                                 # (1, TB) linear term
    xv = y[1:, :]                                                   # (k, TB) factor terms
    sq = jnp.sum(xv * xv, axis=0, keepdims=True)                    # square_of_sum, summed over k

    o_ref[...] = (lin + b_ref[0, 0] + 0.5 * (sq - sos)).astype(o_ref.dtype)  # lane-dense store


def factorization_machine(x, w, b, v, *, block_b: int = 65536, feature_major: bool = False):
    """FactorizationMachine forward.

    x: (b, n)  (or (n, b) if feature_major=True); w: (1, n); b: (1,); v: (k, n)
    returns (b, 1) float32.
    """
    if feature_major:
        xt = x
    else:
        # Single XLA transpose to feature-major. In MCritic.aggregate_graph the node
        # feature matrix is assembled attribute-major, so upstream code can hand the
        # kernel an (n, B) slab directly and skip this.
        xt = x.T
    n, bsz = xt.shape
    k = v.shape[0]

    # Weight-only precompute (once per parameter update, outside the per-call path).
    wv = jnp.concatenate([w, v], axis=0).astype(jnp.float32)            # (1+k, n)
    vsq = jnp.sum(v.astype(jnp.float32) ** 2, axis=0, keepdims=True)    # (1, n)
    b2 = b.reshape(1, 1).astype(jnp.float32)

    # --- batch (lane-axis) tile sizing against the VMEM working-set budget ---
    # Per batch column, double-buffered f32: x block rounds n up to 8 sublanes,
    # the (1, TB) output block occupies 8 sublanes as well.
    n_pad = _round_up(max(n, 1), 8)
    bytes_per_col = 2 * (n_pad + 8) * 4
    tb_budget = max(128, (_VMEM_TILE_BUDGET // bytes_per_col) // 128 * 128)
    tb = max(128, min(_round_up(block_b, 128), tb_budget))

    if bsz <= tb:
        # Single full block: block dims equal the array dims, so no 128-alignment
        # requirement and no padding of any kind.
        tb = bsz
        grid = (1,)
    else:
        # Multi-step grid; tb is a multiple of 128, tail block is partial and its
        # out-of-range lanes are masked by Pallas (no cross-batch reduction, so
        # garbage tail columns cannot pollute valid outputs).
        grid = (pl.cdiv(bsz, tb),)

    out_row = pl.pallas_call(
        fm_kernel,
        out_shape=jax.ShapeDtypeStruct((1, bsz), jnp.float32),
        grid=grid,
        in_specs=[
            pl.BlockSpec((n, tb), lambda i: (0, i)),                 # feature-major x tile (pipelined)
            pl.BlockSpec((1 + k, n), lambda i: (0, 0)),              # stacked [W; V]
            pl.BlockSpec((1, n), lambda i: (0, 0)),                  # folded sum_k V^2
            pl.BlockSpec(memory_space=pltpu.MemorySpace.SMEM),       # bias scalar
        ],
        out_specs=pl.BlockSpec((1, tb), lambda i: (0, i)),
        compiler_params=pltpu.CompilerParams(
            dimension_semantics=("parallel",),          # lets v7x split the grid across its 2 TCs
            vmem_limit_bytes=_VMEM_LIMIT_BYTES),
    )(xt, wv, vsq, b2)

    # (1, bsz) -> (bsz, 1): pure layout plumbing in the wrapper.
    return out_row[0, :].reshape(bsz, 1)


# ---------------------------------------------------------------------------
# MCritic scoring head: lin2(relu(lin1(score)))
# Plain XLA on purpose: a pallas_call costs ~1-2 us fixed overhead for ~300 FLOPs
# here, so kernelizing it is pure loss (perf review).
# ---------------------------------------------------------------------------
def mcritic_head(score, w1, b1, w2, b2):
    """score: (S,); w1: (8, S); b1: (8,); w2: (1, 8); b2: (1,) -> (1,)"""
    h = jnp.maximum(score @ w1.T + b1, 0.0)
    return h @ w2.T + b2


# ---------------------------------------------------------------------------
# Pure-JAX references
# ---------------------------------------------------------------------------
def reference_fm(x, w, b, v):
    x1 = x @ w.T + b                                               # (b, 1)
    xv = x @ v.T                                                   # (b, k)
    square_of_sum = xv * xv
    sum_of_square = (x * x) @ (v * v).T
    x2 = 0.5 * jnp.sum(square_of_sum - sum_of_square, axis=-1, keepdims=True)
    return x1 + x2


def reference_head(score, w1, b1, w2, b2):
    h = jnp.maximum(score @ w1.T + b1, 0.0)
    return h @ w2.T + b2


if __name__ == "__main__":
    key = jax.random.PRNGKey(0)
    keys = jax.random.split(key, 12)

    # --- FactorizationMachine at MCritic's sizes: fm_in_dims = 4 - 1 = 3, k = 3 ---
    n, k, batch = 3, 3, 8
    lin_bound = 1.0 / jnp.sqrt(jnp.float32(n))
    xav_bound = jnp.sqrt(6.0 / (k + n))
    x = jax.random.normal(keys[0], (batch, n), dtype=jnp.float32)
    w = jax.random.uniform(keys[1], (1, n), minval=-lin_bound, maxval=lin_bound,
                           dtype=jnp.float32)
    b = jax.random.uniform(keys[2], (1,), minval=-lin_bound, maxval=lin_bound,
                           dtype=jnp.float32)
    v = jax.random.uniform(keys[3], (k, n), minval=-xav_bound, maxval=xav_bound,
                           dtype=jnp.float32)

    out = factorization_machine(x, w, b, v)
    jax.block_until_ready(out)
    assert out.shape == (batch, 1)
    assert jnp.allclose(out, reference_fm(x, w, b, v), atol=1e-4, rtol=1e-5)

    # --- wider features + ragged batch: multi-step grid with a masked partial tail ---
    n2, batch2 = 32, 300
    lin_bound2 = 1.0 / jnp.sqrt(jnp.float32(n2))
    xav_bound2 = jnp.sqrt(6.0 / (k + n2))
    xb = jax.random.normal(keys[4], (batch2, n2), dtype=jnp.float32)
    wb = jax.random.uniform(keys[5], (1, n2), minval=-lin_bound2, maxval=lin_bound2,
                            dtype=jnp.float32)
    bb = jax.random.uniform(keys[6], (1,), minval=-lin_bound2, maxval=lin_bound2,
                            dtype=jnp.float32)
    vb = jax.random.uniform(keys[7], (k, n2), minval=-xav_bound2, maxval=xav_bound2,
                            dtype=jnp.float32)

    ref2 = reference_fm(xb, wb, bb, vb)
    out2 = factorization_machine(xb, wb, bb, vb, block_b=128)   # grid = cdiv(300,128) = 3
    jax.block_until_ready(out2)
    assert out2.shape == (batch2, 1)
    assert jnp.allclose(out2, ref2, atol=1e-4, rtol=1e-5)

    # Feature-major entry point (what MCritic.aggregate_graph would feed directly).
    out2_fm = factorization_machine(xb.T, wb, bb, vb, block_b=128, feature_major=True)
    jax.block_until_ready(out2_fm)
    assert jnp.allclose(out2_fm, ref2, atol=1e-4, rtol=1e-5)

    # bf16 activations (v5e bandwidth path); upcast happens in-kernel after the load.
    xb_bf = xb.astype(jnp.bfloat16)
    out2_bf = factorization_machine(xb_bf, wb, bb, vb, block_b=128)
    jax.block_until_ready(out2_bf)
    ref2_bf = reference_fm(xb_bf.astype(jnp.float32), wb, bb, vb)
    assert jnp.allclose(out2_bf, ref2_bf, atol=1e-3, rtol=1e-3)

    # --- MCritic scoring head: lin2(relu(lin1(score))), offline_steps = 16 (plain XLA) ---
    steps = 16
    score = jax.random.normal(keys[8], (steps,), dtype=jnp.float32)
    hb1 = 1.0 / jnp.sqrt(jnp.float32(steps))
    hb2 = 1.0 / jnp.sqrt(jnp.float32(8))
    w1 = jax.random.uniform(keys[9], (8, steps), minval=-hb1, maxval=hb1,
                            dtype=jnp.float32)
    b1 = jax.random.uniform(keys[10], (8,), minval=-hb1, maxval=hb1,
                            dtype=jnp.float32)
    w2 = jax.random.uniform(keys[11], (1, 8), minval=-hb2, maxval=hb2,
                            dtype=jnp.float32)
    b2 = jnp.zeros((1,), dtype=jnp.float32)

    head_out = mcritic_head(score, w1, b1, w2, b2)
    jax.block_until_ready(head_out)
    assert head_out.shape == (1,)
    assert jnp.allclose(head_out, reference_head(score, w1, b1, w2, b2),
                        atol=1e-5, rtol=1e-5)

    print("KERNEL_OK")
</pallas_src>

<mosaic_0001>
module attributes {stable_mosaic.version = 11 : i64} {
  func.func @fm_kernel(%arg0: i32, %arg1: memref<3x8xf32, #tpu.memory_space<vmem>>, %arg2: memref<4x3xf32, #tpu.memory_space<vmem>>, %arg3: memref<1x3xf32, #tpu.memory_space<vmem>>, %arg4: memref<1x1xf32, #tpu.memory_space<smem>>, %arg5: memref<1x8xf32, #tpu.memory_space<vmem>>) attributes {dimension_semantics = [#tpu.dimension_semantics<parallel>], iteration_bounds = array<i64: 1>, scalar_prefetch = 0 : i64, scratch_operands = 0 : i64, tpu.core_type = #tpu.core_type<tc>, window_params = [{transform_indices = @transform_0, window_bounds = array<i64: 3, 8>}, {pipeline_mode = #tpu.pipeline_mode<synchronous>, transform_indices = @transform_1, window_bounds = array<i64: 4, 3>}, {pipeline_mode = #tpu.pipeline_mode<synchronous>, transform_indices = @transform_2, window_bounds = array<i64: 1, 3>}, {transform_indices = @transform_3, window_bounds = array<i64: 1, 1>}, {transform_indices = @transform_4, window_bounds = array<i64: 1, 8>}]} {
    %c0 = arith.constant 0 : index
    %c0_0 = arith.constant 0 : index
    %0 = vector.load %arg1[%c0, %c0_0] : memref<3x8xf32, #tpu.memory_space<vmem>>, vector<3x8xf32>
    %c0_1 = arith.constant 0 : index
    %c0_2 = arith.constant 0 : index
    %1 = vector.load %arg2[%c0_1, %c0_2] : memref<4x3xf32, #tpu.memory_space<vmem>>, vector<4x3xf32>
    %cst = arith.constant dense<0.000000e+00> : vector<4x8xf32>
    %2 = tpu.matmul %1, %0, %cst {dimension_numbers = #tpu.dot_dimension_numbers<[1], [0], [0], [1], [0, 0, 1, 1], [], []>} : vector<4x3xf32>, vector<3x8xf32>, vector<4x8xf32> -> vector<4x8xf32>
    %c0_3 = arith.constant 0 : index
    %c0_4 = arith.constant 0 : index
    %3 = vector.load %arg3[%c0_3, %c0_4] : memref<1x3xf32, #tpu.memory_space<vmem>>, vector<1x3xf32>
    %4 = arith.mulf %0, %0 : vector<3x8xf32>
    %cst_5 = arith.constant dense<0.000000e+00> : vector<1x8xf32>
    %5 = tpu.matmul %3, %4, %cst_5 {dimension_numbers = #tpu.dot_dimension_numbers<[1], [0], [0], [1], [0, 0, 1, 1], [], []>} : vector<1x3xf32>, vector<3x8xf32>, vector<1x8xf32> -> vector<1x8xf32>
    %6 = vector.extract_strided_slice %2 {offsets = [0, 0], sizes = [1, 8], strides = [1, 1]} : vector<4x8xf32> to vector<1x8xf32>
    %7 = vector.extract_strided_slice %2 {offsets = [1, 0], sizes = [3, 8], strides = [1, 1]} : vector<4x8xf32> to vector<3x8xf32>
    %8 = arith.mulf %7, %7 : vector<3x8xf32>
    %cst_6 = arith.constant dense<0.000000e+00> : vector<8xf32>
    %9 = vector.multi_reduction <add>, %8, %cst_6 [0] : vector<3x8xf32> to vector<8xf32>
    %10 = vector.shape_cast %9 : vector<8xf32> to vector<1x8xf32>
    %c0_7 = arith.constant 0 : index
    %c0_8 = arith.constant 0 : index
    %11 = memref.load %arg4[%c0_7, %c0_8] : memref<1x1xf32, #tpu.memory_space<smem>>
    %12 = vector.broadcast %11 : f32 to vector<1x8xf32>
    %13 = arith.addf %6, %12 : vector<1x8xf32>
    %14 = arith.subf %10, %5 : vector<1x8xf32>
    %cst_9 = arith.constant 5.000000e-01 : f32
    %15 = vector.broadcast %cst_9 : f32 to vector<1x8xf32>
    %16 = arith.mulf %15, %14 : vector<1x8xf32>
    %17 = arith.addf %13, %16 : vector<1x8xf32>
    %c0_10 = arith.constant 0 : index
    %c0_11 = arith.constant 0 : index
    %18 = vector.load %arg5[%c0_10, %c0_11] : memref<1x8xf32, #tpu.memory_space<vmem>>, vector<1x8xf32>
    tpu.vector_store %arg5[%c0_10, %c0_11], %17 {strides = array<i32>} : memref<1x8xf32, #tpu.memory_space<vmem>>, vector<1x8xf32>,
    return
  }
  func.func @transform_0(%arg0: i32) -> (i32, i32) {
    %c0_i32 = arith.constant 0 : i32
    %c0_i32_0 = arith.constant 0 : i32
    return %c0_i32, %arg0 : i32, i32
  }
  func.func @transform_1(%arg0: i32) -> (i32, i32) {
    %c0_i32 = arith.constant 0 : i32
    %c0_i32_0 = arith.constant 0 : i32
    %c0_i32_1 = arith.constant 0 : i32
    return %c0_i32, %c0_i32_0 : i32, i32
  }
  func.func @transform_2(%arg0: i32) -> (i32, i32) {
    %c0_i32 = arith.constant 0 : i32
    %c0_i32_0 = arith.constant 0 : i32
    %c0_i32_1 = arith.constant 0 : i32
    return %c0_i32, %c0_i32_0 : i32, i32
  }
  func.func @transform_3(%arg0: i32) -> (i32, i32) {
    %c0_i32 = arith.constant 0 : i32
    %c0_i32_0 = arith.constant 0 : i32
    %c0_i32_1 = arith.constant 0 : i32
    return %c0_i32, %c0_i32_0 : i32, i32
  }
  func.func @transform_4(%arg0: i32) -> (i32, i32) {
    %c0_i32 = arith.constant 0 : i32
    %c0_i32_0 = arith.constant 0 : i32
    return %c0_i32, %arg0 : i32, i32
  }
}

</mosaic_0001>

<bundles_post_ra>
// kernel: tpu_custom_call.1
= control target key start
LH: loop header
LB: loop body
LE: loop exit
PB: predicated region body
PF: predicated region fallthrough
CT: control target
= control target key end

     0   :  { %10 = vsyncpa [#allocation4], 0  ;;  %s356_s0 = inlined_call_operand.hbm [shape: f32[3,8], index: 0, kind: input, shape index: {}]   ;;  %s357_s1 = inlined_call_operand.vmem [shape: f32[4,3], index: 1, kind: input, shape index: {}]   ;;  %s358_s2 = inlined_call_operand.vmem [shape: f32[1,3], index: 2, kind: input, shape index: {}]   ;;  %s359_s3 = inlined_call_operand.<no memory space> [shape: f32[1,1], index: 3, kind: input, shape index: {}]   ;;  %s360_s4 = inlined_call_operand.hbm [shape: f32[1,8], index: 4, kind: output, shape index: {}]  }
   0x1   :  { %11 = vsyncpa [#allocation5], 0  ;;  %s294_s15 = smov [#allocation3]   ;;  %s246_s19 = scalar_lea.hbm %s356_s0, 64 }
   0x2   :  { %s18_s16 = sshll.u32 %s294_s15, 4  ;;  %p247_p0 = scmp.ne.s32.totalorder %s356_s0, %s246_s19  ;;  %s19_s16 = int_to_ptr.vmem [resolvable:$true] %s18_s16 }
   0x3   :  { %p250_p1 = scmp.lt.u32.totalorder %s246_s19, %s356_s0 }
   0x5   :  { %p252_p2 = pnand %p250_p1, %p247_p0 }
   0x7   :  { %255 = shalt.err (!%p252_p2)
}
   0x8   :  { %s256_s24 = scalar_lea.vmem %s19_s16, 64  ;;  %p261_p4 = scmp.lt.s32.totalorder %s19_s16, %s19_s16 }
   0x9   :  { %p257_p3 = scmp.ne.s32.totalorder %s19_s16, %s256_s24  ;;  %p262_p5 = scmp.lt.s32.totalorder %s256_s24, %s256_s24 }
   0xb   :  { %p263_p6 = por %p262_p5, %p261_p4 }
   0xd   :  { %p264_p7 = pnand %p263_p6, %p257_p3 }
   0xf   :  { %267 = shalt.err (!%p264_p7)
}
  0x10   :  { %21 = dma.hbm_to_vmem [thread:$0]  %s356_s0, 64, %s19_s16, [#allocation4]  }
  0x11   :  { %290 = dma.done.wait [#allocation4], 64  }
  0x12   :  { %291 = vsyncadd [#allocation4], 4294967232  ;;  %v295_v0 = vmov 0.0   ;;  %vm296_vm0 = vmmov 0   ;;  %vm37_vm1 = vcmask 1042432   ;;  %vm33_vm2 = vcmask 23552  }
  0x13   :  { %232 = vmatprep.subr.mxu0 %v295_v0  ;;  %234 = vmatprep.mubr.msk.f32.mxu0 %vm296_vm0, %v295_v0  ;;  %v31_v1 = vld [vmem:[#allocation3] sm:$0x7]  ;;  %vm193_vm3 = vcmask 59392   ;;  %v202_v18 = vstv %s359_s3  ;;  %vm207_vm4 = vcmask 57344  }
  0x14   :  { %237 = vmatprep.subr.mxu1 %v295_v0  ;;  %239 = vmatprep.mubr.msk.f32.mxu1 %vm296_vm0, %v295_v0  ;;  %v32_v2 = vld [vmem:[%s357_s1] sm:$0xf]  ;;  %v112_v3 = vmul.f32 %v31_v1, %v31_v1 }
  0x15   :  { %233 = vmatpush3.msk.msra.mxu0 %vm37_vm1, %v31_v1  ;;  %v111_v4 = vld [vmem:[%s358_s2] sm:$0x1]  ;;  %s297_s2 = smov [#allocation6]  }
  0x16   :  { %235 = vmatmul.mubr.msk.f32.vlgmr.msra.gmra.mrb[0].mxu0 %vm33_vm2, %v32_v2  ;;  %238 = vmatpush3.msk.msra.mxu1 %vm37_vm1, %v112_v3  ;;  %s215_s5 = sshll.u32 %s297_s2, 4  ;;  %s216_s5 = int_to_ptr.vmem [resolvable:$true] %s215_s5 }
  0x17   :  { %240 = vmatmul.mubr.msk.f32.vlgmr.msra.gmra.mrb[0].mxu1 %vm33_vm2, %v111_v4  ;;  %s268_s6 = scalar_lea.vmem %s216_s5, 16  ;;  %s272_s7 = scalar_lea.vmem %s216_s5, 32 }
  0x18   :  { %p269_p8 = scmp.ne.s32.totalorder %s216_s5, %s268_s6  ;;  %p273_p9 = scmp.lt.s32.totalorder %s216_s5, %s216_s5 }
  0x19   :  { %p274_p10 = scmp.lt.s32.totalorder %s272_s7, %s268_s6 }
  0x1b   :  { %p275_p11 = por %p274_p10, %p273_p9 }
  0x1d   :  { %p276_p12 = pnand %p275_p11, %p269_p8 }
  0xe9   :  { %v107_v5 = vpop.f32.mrb[0].mxu0 }
  0xea   :  { %v189_v6 = vmul.f32 %v107_v5, %v107_v5  ;;  %v236_v7 = vpop.f32.mrb[1].mxu0  ;;  %v185_v8 = vpop.f32.mrb[0].mxu1  ;;  %v203_v20 = vadd.f32 %v202_v18, %v107_v5 }
  0xeb   :  { %v241_v10 = vpop.f32.mrb[1].mxu1 }
  0xec   :  { %v191_v9 = vrot.slane %v189_v6, 1 }
  0xee   :  { %v194_v11 = vsel %vm193_vm3, %v191_v9, 0.0 }
  0xef   :  { %v195_v12 = vrot.slane %v194_v11, 4 }
  0xf1   :  { %v196_v13 = vadd.f32 %v195_v12, %v194_v11 }
  0xf3   :  { %v197_v14 = vrot.slane %v196_v13, 2 }
  0xf5   :  { %v198_v15 = vadd.f32 %v197_v14, %v196_v13 }
  0xf7   :  { %v199_v16 = vrot.slane %v198_v15, 1 }
  0xf9   :  { %v200_v17 = vadd.f32 %v199_v16, %v198_v15 }
  0xfb   :  { %v204_v19 = vsub.f32 %v200_v17, %v185_v8 }
  0xfd   :  { %v205_v21 = vmul.f32 0.5, %v204_v19 }
  0xff   :  { %v206_v22 = vadd.f32 %v205_v21, %v203_v20 }
 0x101   :  { %208 = vst.msk [vmem:[#allocation6] sm:$0x1] %vm207_vm4, %v206_v22 }
 0x102   :  { %279 = shalt.err (!%p276_p12)
}
 0x103   :  { %s280_s3 = scalar_lea.hbm %s360_s4, 16 }
 0x104   :  { %p281_p13 = scmp.ne.s32.totalorder %s360_s4, %s280_s3  ;;  %p284_p0 = scmp.lt.u32.totalorder %s280_s3, %s360_s4 }
 0x106   :  { %p286_p1 = pnand %p284_p0, %p281_p13 }
 0x108   :  { %289 = shalt.err (!%p286_p1)
}
 0x109   :  { %218 = dma.vmem_to_hbm [thread:$0]  %s216_s5, 16, %s360_s4, [#allocation5]  }
 0x10a   :  { %292 = dma.done.wait [#allocation5], 16  }
 0x10b   :  { %293 = vsyncadd [#allocation5], 4294967280 }
 0x10c   :  { %222 = vsyncpa [#allocation4], 1 }
 0x10d   :  { %223 = vsyncpa [#allocation5], 1 }

</bundles_post_ra>
